<compile_context>
chip_gen: v6e
topology: v6e:2x2x1
jax: 0.10.0
libtpu: 0.0.40
codegen_flags: <defaults>
</compile_context>

<pallas_src>
import functools

import jax
import jax.numpy as jnp
from jax.experimental import pallas as pl
from jax.experimental.pallas import tpu as pltpu

INPUT_SIZE = 48
HIDDEN_SIZE = 64
_DEFAULT_TILE_B = 1024   # multiple of 8 and 128; fits easily in scoped VMEM
_LANE = 128


def _round_up(n, m):
    return ((n + m - 1) // m) * m


def _mlp_kernel(xt_ref, w1_ref, b1_ref, w2_ref, b2_ref, w3_ref, b3_ref, o_ref):
    """One batch tile, batch on lanes.

    xt_ref: (48, T) bf16    w1_ref: (64, 48) bf16   b1_ref: (64, 1) f32
    w2_ref: (64, 64) bf16   b2_ref: (64, 1) f32
    w3_ref: (64, 1)  f32    b3_ref: (1, 1)  f32
    o_ref : (1, T)   f32   (lane-dense output slab)
    """
    xt = xt_ref[...]                                                   # (48, T) bf16

    # fc1 + ReLU (MXU matmul, f32 accumulation; bias/ReLU in f32)
    h1 = jnp.dot(w1_ref[...], xt, preferred_element_type=jnp.float32)  # (64, T) f32
    h1 = jnp.maximum(h1 + b1_ref[...], 0.0)

    # fc2 + ReLU
    h2 = jnp.dot(w2_ref[...], h1.astype(jnp.bfloat16),
                 preferred_element_type=jnp.float32)                   # (64, T) f32
    h2 = jnp.maximum(h2 + b2_ref[...], 0.0)

    # fc3 (N=1): VPU multiply + sublane reduce instead of an MXU pass.
    z = jnp.sum(h2 * w3_ref[...], axis=0, keepdims=True) + b3_ref[...]  # (1, T) f32

    o_ref[...] = jax.nn.sigmoid(z)                                      # unmasked store


def prepare_params(params):
    """Convert (in, out)-layout f32 params into the kernel layout:
    transposed weights (out, in) as bf16 for the MXU, biases as f32 columns."""
    w1, b1, w2, b2, w3, b3 = params
    return (
        jnp.asarray(w1.T, jnp.bfloat16),                         # (64, 48)
        jnp.asarray(b1, jnp.float32).reshape(HIDDEN_SIZE, 1),    # (64, 1)
        jnp.asarray(w2.T, jnp.bfloat16),                         # (64, 64)
        jnp.asarray(b2, jnp.float32).reshape(HIDDEN_SIZE, 1),    # (64, 1)
        jnp.asarray(w3, jnp.float32).reshape(HIDDEN_SIZE, 1),    # (64, 1)
        jnp.asarray(b3, jnp.float32).reshape(1, 1),              # (1, 1)
    )


@functools.partial(jax.jit, static_argnames=("tile_b",))
def heuristic_nn_forward(x, kernel_params, tile_b=None):
    """x: (B, INPUT_SIZE) float32 -> (B, 1) float32."""
    w1t, b1, w2t, b2, w3, b3 = kernel_params
    B = x.shape[0]

    if tile_b is None:
        tile_b = _DEFAULT_TILE_B if B >= _DEFAULT_TILE_B else _round_up(B, _LANE)
    assert tile_b % _LANE == 0 and tile_b % 8 == 0
    b_pad = _round_up(B, tile_b)
    num_tiles = b_pad // tile_b

    # Pad batch, cast the streaming matmul operand to bf16, put batch on lanes.
    xp = jnp.pad(x, ((0, b_pad - B), (0, 0)))
    xt = jnp.asarray(xp, jnp.bfloat16).T                         # (48, B_pad)

    resident = lambda shape: pl.BlockSpec(shape, lambda i: (0, 0))

    out = pl.pallas_call(
        _mlp_kernel,
        out_shape=jax.ShapeDtypeStruct((1, b_pad), jnp.float32),
        grid_spec=pl.GridSpec(
            grid=(num_tiles,),
            in_specs=[
                pl.BlockSpec((INPUT_SIZE, tile_b), lambda i: (0, i)),  # x^T streams
                resident(w1t.shape), resident(b1.shape),
                resident(w2t.shape), resident(b2.shape),
                resident(w3.shape), resident(b3.shape),
            ],
            out_specs=pl.BlockSpec((1, tile_b), lambda i: (0, i)),     # lane-dense
        ),
        compiler_params=pltpu.CompilerParams(
            dimension_semantics=("parallel",),   # sharded across TCs on v7x
            vmem_limit_bytes=32 * 1024 * 1024,
        ),
    )(xt, w1t, b1, w2t, b2, w3, b3)

    return out[0, :B].reshape(B, 1)


def init_params(key, input_size=INPUT_SIZE, hidden_size=HIDDEN_SIZE):
    """Deterministic synthetic init matching nn.Linear shapes (stored (in, out))."""
    k1, k2, k3, k4, k5, k6 = jax.random.split(key, 6)

    def lin(kw, kb, fan_in, fan_out):
        bound = 1.0 / jnp.sqrt(fan_in)
        w = jax.random.uniform(kw, (fan_in, fan_out), jnp.float32, -bound, bound)
        b = jax.random.uniform(kb, (1, fan_out), jnp.float32, -bound, bound)
        return w, b

    w1, b1 = lin(k1, k2, input_size, hidden_size)
    w2, b2 = lin(k3, k4, hidden_size, hidden_size)
    w3, b3 = lin(k5, k6, hidden_size, 1)
    return (w1, b1, w2, b2, w3, b3)


def reference_forward(x, params):
    w1, b1, w2, b2, w3, b3 = params
    h1 = jnp.maximum(x @ w1 + b1, 0.0)
    h2 = jnp.maximum(h1 @ w2 + b2, 0.0)
    return jax.nn.sigmoid(h2 @ w3 + b3)


if __name__ == "__main__":
    key = jax.random.PRNGKey(0)
    k_params, k_x = jax.random.split(key)

    batch = 300   # deliberately not a multiple of the tile -> exercises padding
    params = init_params(k_params)
    kparams = prepare_params(params)
    x = jax.random.normal(k_x, (batch, INPUT_SIZE), jnp.float32)

    ref = reference_forward(x, params)

    # Multi-tile path (3 grid steps of 128) and auto-tile path (single 384 tile).
    out_multi = jax.block_until_ready(heuristic_nn_forward(x, kparams, tile_b=128))
    out_auto = jax.block_until_ready(heuristic_nn_forward(x, kparams))

    assert out_multi.shape == (batch, 1)
    assert out_auto.shape == (batch, 1)
    # bf16 matmul operands (f32 accumulation) -> loosened tolerance vs f32 reference.
    assert jnp.allclose(out_multi, ref, atol=2e-2, rtol=0.0), float(
        jnp.max(jnp.abs(out_multi - ref)))
    assert jnp.allclose(out_auto, ref, atol=2e-2, rtol=0.0), float(
        jnp.max(jnp.abs(out_auto - ref)))

    print("KERNEL_OK")
</pallas_src>

<mosaic_0001>
module attributes {stable_mosaic.version = 11 : i64} {
  func.func @_mlp_kernel(%arg0: i32, %arg1: memref<48x128xbf16, #tpu.memory_space<vmem>>, %arg2: memref<64x48xbf16, #tpu.memory_space<vmem>>, %arg3: memref<64x1xf32, #tpu.memory_space<vmem>>, %arg4: memref<64x64xbf16, #tpu.memory_space<vmem>>, %arg5: memref<64x1xf32, #tpu.memory_space<vmem>>, %arg6: memref<64x1xf32, #tpu.memory_space<vmem>>, %arg7: memref<1x1xf32, #tpu.memory_space<vmem>>, %arg8: memref<1x128xf32, #tpu.memory_space<vmem>>) attributes {dimension_semantics = [#tpu.dimension_semantics<parallel>], iteration_bounds = array<i64: 3>, scalar_prefetch = 0 : i64, scratch_operands = 0 : i64, tpu.core_type = #tpu.core_type<tc>, window_params = [{transform_indices = @transform_0, window_bounds = array<i64: 48, 128>}, {pipeline_mode = #tpu.pipeline_mode<synchronous>, transform_indices = @transform_1, window_bounds = array<i64: 64, 48>}, {pipeline_mode = #tpu.pipeline_mode<synchronous>, transform_indices = @transform_2, window_bounds = array<i64: 64, 1>}, {pipeline_mode = #tpu.pipeline_mode<synchronous>, transform_indices = @transform_3, window_bounds = array<i64: 64, 64>}, {pipeline_mode = #tpu.pipeline_mode<synchronous>, transform_indices = @transform_4, window_bounds = array<i64: 64, 1>}, {pipeline_mode = #tpu.pipeline_mode<synchronous>, transform_indices = @transform_5, window_bounds = array<i64: 64, 1>}, {pipeline_mode = #tpu.pipeline_mode<synchronous>, transform_indices = @transform_6, window_bounds = array<i64: 1, 1>}, {transform_indices = @transform_7, window_bounds = array<i64: 1, 128>}]} {
    %c0 = arith.constant 0 : index
    %c0_0 = arith.constant 0 : index
    %0 = vector.load %arg1[%c0, %c0_0] : memref<48x128xbf16, #tpu.memory_space<vmem>>, vector<48x128xbf16>
    %c0_1 = arith.constant 0 : index
    %c0_2 = arith.constant 0 : index
    %1 = vector.load %arg2[%c0_1, %c0_2] : memref<64x48xbf16, #tpu.memory_space<vmem>>, vector<64x48xbf16>
    %cst = arith.constant dense<0.000000e+00> : vector<64x128xf32>
    %2 = tpu.matmul %1, %0, %cst {dimension_numbers = #tpu.dot_dimension_numbers<[1], [0], [0], [1], [0, 0, 1, 1], [], []>} : vector<64x48xbf16>, vector<48x128xbf16>, vector<64x128xf32> -> vector<64x128xf32>
    %c0_3 = arith.constant 0 : index
    %c0_4 = arith.constant 0 : index
    %3 = vector.load %arg3[%c0_3, %c0_4] : memref<64x1xf32, #tpu.memory_space<vmem>>, vector<64x1xf32>
    %4 = vector.broadcast %3 : vector<64x1xf32> to vector<64x128xf32>
    %5 = arith.addf %2, %4 : vector<64x128xf32>
    %cst_5 = arith.constant 0.000000e+00 : f32
    %6 = vector.broadcast %cst_5 : f32 to vector<64x128xf32>
    %7 = arith.maximumf %5, %6 : vector<64x128xf32>
    %c0_6 = arith.constant 0 : index
    %c0_7 = arith.constant 0 : index
    %8 = vector.load %arg4[%c0_6, %c0_7] : memref<64x64xbf16, #tpu.memory_space<vmem>>, vector<64x64xbf16>
    %9 = arith.truncf %7 : vector<64x128xf32> to vector<64x128xbf16>
    %cst_8 = arith.constant dense<0.000000e+00> : vector<64x128xf32>
    %10 = tpu.matmul %8, %9, %cst_8 {dimension_numbers = #tpu.dot_dimension_numbers<[1], [0], [0], [1], [0, 0, 1, 1], [], []>} : vector<64x64xbf16>, vector<64x128xbf16>, vector<64x128xf32> -> vector<64x128xf32>
    %c0_9 = arith.constant 0 : index
    %c0_10 = arith.constant 0 : index
    %11 = vector.load %arg5[%c0_9, %c0_10] : memref<64x1xf32, #tpu.memory_space<vmem>>, vector<64x1xf32>
    %12 = vector.broadcast %11 : vector<64x1xf32> to vector<64x128xf32>
    %13 = arith.addf %10, %12 : vector<64x128xf32>
    %cst_11 = arith.constant 0.000000e+00 : f32
    %14 = vector.broadcast %cst_11 : f32 to vector<64x128xf32>
    %15 = arith.maximumf %13, %14 : vector<64x128xf32>
    %c0_12 = arith.constant 0 : index
    %c0_13 = arith.constant 0 : index
    %16 = vector.load %arg6[%c0_12, %c0_13] : memref<64x1xf32, #tpu.memory_space<vmem>>, vector<64x1xf32>
    %17 = vector.broadcast %16 : vector<64x1xf32> to vector<64x128xf32>
    %18 = arith.mulf %15, %17 : vector<64x128xf32>
    %cst_14 = arith.constant dense<0.000000e+00> : vector<128xf32>
    %19 = vector.multi_reduction <add>, %18, %cst_14 [0] : vector<64x128xf32> to vector<128xf32>
    %20 = vector.shape_cast %19 : vector<128xf32> to vector<1x128xf32>
    %c0_15 = arith.constant 0 : index
    %c0_16 = arith.constant 0 : index
    %21 = vector.load %arg7[%c0_15, %c0_16] : memref<1x1xf32, #tpu.memory_space<vmem>>, vector<1x1xf32>
    %22 = vector.broadcast %21 : vector<1x1xf32> to vector<1x128xf32>
    %23 = arith.addf %20, %22 : vector<1x128xf32>
    %24 = arith.negf %23 : vector<1x128xf32>
    %25 = math.exp %24 : vector<1x128xf32>
    %cst_17 = arith.constant 1.000000e+00 : f32
    %26 = vector.broadcast %cst_17 : f32 to vector<1x128xf32>
    %27 = arith.addf %26, %25 : vector<1x128xf32>
    %28 = arith.divf %26, %27 : vector<1x128xf32>
    %c0_18 = arith.constant 0 : index
    %c0_19 = arith.constant 0 : index
    %29 = vector.load %arg8[%c0_18, %c0_19] : memref<1x128xf32, #tpu.memory_space<vmem>>, vector<1x128xf32>
    tpu.vector_store %arg8[%c0_18, %c0_19], %28 {strides = array<i32>} : memref<1x128xf32, #tpu.memory_space<vmem>>, vector<1x128xf32>,
    return
  }
  func.func @transform_0(%arg0: i32) -> (i32, i32) {
    %c0_i32 = arith.constant 0 : i32
    %c0_i32_0 = arith.constant 0 : i32
    return %c0_i32, %arg0 : i32, i32
  }
  func.func @transform_1(%arg0: i32) -> (i32, i32) {
    %c0_i32 = arith.constant 0 : i32
    %c0_i32_0 = arith.constant 0 : i32
    %c0_i32_1 = arith.constant 0 : i32
    return %c0_i32, %c0_i32_0 : i32, i32
  }
  func.func @transform_2(%arg0: i32) -> (i32, i32) {
    %c0_i32 = arith.constant 0 : i32
    %c0_i32_0 = arith.constant 0 : i32
    %c0_i32_1 = arith.constant 0 : i32
    return %c0_i32, %c0_i32_0 : i32, i32
  }
  func.func @transform_3(%arg0: i32) -> (i32, i32) {
    %c0_i32 = arith.constant 0 : i32
    %c0_i32_0 = arith.constant 0 : i32
    %c0_i32_1 = arith.constant 0 : i32
    return %c0_i32, %c0_i32_0 : i32, i32
  }
  func.func @transform_4(%arg0: i32) -> (i32, i32) {
    %c0_i32 = arith.constant 0 : i32
    %c0_i32_0 = arith.constant 0 : i32
    %c0_i32_1 = arith.constant 0 : i32
    return %c0_i32, %c0_i32_0 : i32, i32
  }
  func.func @transform_5(%arg0: i32) -> (i32, i32) {
    %c0_i32 = arith.constant 0 : i32
    %c0_i32_0 = arith.constant 0 : i32
    %c0_i32_1 = arith.constant 0 : i32
    return %c0_i32, %c0_i32_0 : i32, i32
  }
  func.func @transform_6(%arg0: i32) -> (i32, i32) {
    %c0_i32 = arith.constant 0 : i32
    %c0_i32_0 = arith.constant 0 : i32
    %c0_i32_1 = arith.constant 0 : i32
    return %c0_i32, %c0_i32_0 : i32, i32
  }
  func.func @transform_7(%arg0: i32) -> (i32, i32) {
    %c0_i32 = arith.constant 0 : i32
    %c0_i32_0 = arith.constant 0 : i32
    return %c0_i32, %arg0 : i32, i32
  }
}

</mosaic_0001>

<bundles_post_ra>
// kernel: heuristic_nn_forward.1
= control target key start
LH: loop header
LB: loop body
LE: loop exit
PB: predicated region body
PF: predicated region fallthrough
CT: control target
= control target key end

     0   :  { %s1176_s0 = inlined_call_operand.vmem [shape: bf16[48,384], index: 0, kind: input, shape index: {}]   ;;  %s1177_s1 = inlined_call_operand.vmem [shape: bf16[64,48], index: 1, kind: input, shape index: {}]   ;;  %s1178_s2 = inlined_call_operand.vmem [shape: f32[64,1], index: 2, kind: input, shape index: {}]   ;;  %s1179_s3 = inlined_call_operand.vmem [shape: bf16[64,64], index: 3, kind: input, shape index: {}]   ;;  %s1180_s4 = inlined_call_operand.vmem [shape: f32[64,1], index: 4, kind: input, shape index: {}]   ;;  %s1181_s5 = inlined_call_operand.vmem [shape: f32[64,1], index: 5, kind: input, shape index: {}]   ;;  %s1182_s6 = inlined_call_operand.<no memory space> [shape: f32[1,1], index: 6, kind: input, shape index: {}]   ;;  %s1183_s7 = inlined_call_operand.vmem [shape: f32[1,384], index: 7, kind: output, shape index: {}]  }
   0x1   :  { %v12_v0 = vstv %s1182_s6 }
   0x2   :  { %13 = vst [vmem:[#allocation2] sm:$0x1] %v12_v0 }
   0x3   :  { %s1018_s26 = smov 0   ;;  %s1020_s27 = smov 0  }
   0x4   :  { %s1022_s28 = smov 0  }
   0x5 LB: > { %s833_s6 = sadd.s32 4294967295, %s972_s28   ;;  %s1035_s29 = sadd.s32 1, %s972_s28   ;;  %s972_s28 = sphi %s1022_s28, %s1186_s28   ;;  %s968_s27 = sphi %s1020_s27, %s1185_s27   ;;  %s964_s26 = sphi %s1018_s26, %s1184_s26  }
   0x6   : > { %s23_s30 = ssub.s32 %s972_s28, %s1035_s29  ;;  %s26_s8 = sadd.s32 1, %s968_s27 }
   0x7   : > { %p24_p0 = scmp.eq.s32.totalorder %s23_s30, 0  ;;  %p33_p1 = scmp.ne.s32.totalorder %s968_s27, %s964_s26 }
   0x8   : > { %p34_p2 = scmp.eq.s32.totalorder %s972_s28, 0  ;;  %p836_p4 = scmp.ge.s32.totalorder %s972_s28, 3 }
   0x9   : > { %s1044_s9 = scalar_select %p24_p0, %s968_s27, %s26_s8  }
   0xa   : > { %p35_p3 = por %p34_p2, %p33_p1  ;;  %229 = sbr.rel (%p836_p4) target bundleno = 23 (0x17), region = 40 }
   0xf   : > { %232 = sbr.rel (!%p35_p3) target bundleno = 23 (0x17), region = 44  ;;  %s234_s10 = sand.u32 (%p35_p3), 1, %s968_s27  }
  0x10   : > { %s837_s11 = sshll.u32 (%p35_p3), %s972_s28, 2  ;;  %s906_s12 = smul.u32 (%p35_p3), 24, %s234_s10 }
  0x11   : > { %s238_s15 = scalar_lea.vmem (%p35_p3), %s1176_s0, %s837_s11 }
  0x12   : > { %v255_v1 = vld [vmem:[%s238_s15] sm:$0xf] (%p35_p3)  ;;  %v257_v2 = vld [vmem:[%s238_s15 + $0xc] sm:$0xf] (%p35_p3)  ;;  %v259_v3 = vld [vmem:[%s238_s15 + $0x18] sm:$0xf] (%p35_p3) }
  0x13   : > { %v261_v4 = vld [vmem:[%s238_s15 + $0x24] sm:$0xf] (%p35_p3)  ;;  %v263_v5 = vld [vmem:[%s238_s15 + $0x30] sm:$0xf] (%p35_p3)  ;;  %s236_s16 = scalar_lea.vmem (%p35_p3), [#allocation3], %s906_s12 }
  0x14   : > { %256 = vst [vmem:[%s236_s16] sm:$0xf] %v255_v1  ;;  %258 = vst [vmem:[%s236_s16 + $0x4] sm:$0xf] %v257_v2  ;;  %v265_v6 = vld [vmem:[%s238_s15 + $0x3c] sm:$0xf] }
  0x15   : > { %260 = vst [vmem:[%s236_s16 + $0x8] sm:$0xf] %v259_v3  ;;  %262 = vst [vmem:[%s236_s16 + $0xc] sm:$0xf] %v261_v4 }
  0x16   : > { %264 = vst [vmem:[%s236_s16 + $0x10] sm:$0xf] %v263_v5  ;;  %266 = vst [vmem:[%s236_s16 + $0x14] sm:$0xf] %v265_v6 }
  0x17 PF: > { %p838_p5 = scmp.ge.s32.totalorder %s972_s28, 1  ;;  %p301_p6 = scmp.lt.s32.totalorder %s972_s28, 4 }
  0x19   : > { %p302_p7 = pnand %p838_p5, %p301_p6 }
  0x1a   : > { %s308_s17 = sand.u32 (!%p302_p7), 1, %s964_s26   ;;  %p337_p8 = scmp.lt.s32.totalorder (!%p302_p7), %s833_s6, 2 }
  0x1b   : > { %305 = sbr.rel (%p302_p7) target bundleno = 539 (0x21b), region = 85 }
  0x1c   : > { %s907_s20 = smul.u32 (!%p302_p7), 24, %s308_s17 }
  0x1e   : > { %s310_s21 = scalar_lea.vmem (!%p302_p7), [#allocation3], %s907_s20 }
  0x20   : > { %v938_v7 = vld [vmem:[%s1177_s1] sm:$0xff]   ;;  %vm441_vm0 = vcmask 392192   ;;  %v974_v8 = vmov 0   ;;  %v935_v9 = vld [vmem:[%s310_s21 + $0x10] sm:$0xff]   ;;  %vm607_vm1 = vcmask 523264   ;;  %s1188_s6 = smov (!%p337_p8, %s833_s6), 2 }
  0x21   : > { %882 = vmatprep.mubr.msk.bf16.mxu0 %vm441_vm0, %v938_v7  ;;  %933 = vset.pattern.permute.xlu0 %v974_v8  ;;  %v936_v10 = vld [vmem:[%s310_s21 + $0x8] sm:$0xff]   ;;  %v937_v12 = vld [vmem:[%s310_s21] sm:$0xff]   ;;  %s339_s10 = scalar_lea.vmem %s1183_s7, %s1188_s6 }
  0x22   : > { %934 = vset.pattern.permute.xlu1 %v974_v8  ;;  %876 = vmatprep.subr.bf16.mxu0 %v935_v9  ;;  %v361_v11 = vld [vmem:[%s1178_s2 + $0x30] sm:$0xff]  ;;  %v359_v13 = vld [vmem:[%s1178_s2 + $0x20] sm:$0xff]  ;;  %v362_v14 = vld [vmem:[%s1178_s2 + $0x38] sm:$0xff] }
  0x23   : > { %877 = vmatpush3.bf16.msra.mxu0 %v935_v9  ;;  %395 = vperm.xlu0 %933, %v361_v11   ;;  %v360_v15 = vld [vmem:[%s1178_s2 + $0x28] sm:$0xff]  ;;  %v357_v16 = vld [vmem:[%s1178_s2 + $0x10] sm:$0xff]  ;;  %v358_v18 = vld [vmem:[%s1178_s2 + $0x18] sm:$0xff] }
  0x24   : > { %878 = vmatprep.subr.bf16.mxu0 %v936_v10  ;;  %385 = vperm.xlu1 %934, %v359_v13   ;;  %v939_v17 = vld [vmem:[%s1177_s1 + $0x8] sm:$0xff]   ;;  %v940_v19 = vld [vmem:[%s1177_s1 + $0x10] sm:$0xff]   ;;  %v355_v20 = vld [vmem:[%s1178_s2] sm:$0xff] }
  0x25   : > { %v356_v21 = vld [vmem:[%s1178_s2 + $0x8] sm:$0xff]  ;;  %v539_v22 = vld [vmem:[%s1180_s4] sm:$0xff]  ;;  %v941_v23 = vld [vmem:[%s1177_s1 + $0x18] sm:$0xff]  }
  0x26   : > { %v540_v24 = vld [vmem:[%s1180_s4 + $0x8] sm:$0xff]  ;;  %v541_v25 = vld [vmem:[%s1180_s4 + $0x10] sm:$0xff]  ;;  %v542_v26 = vld [vmem:[%s1180_s4 + $0x18] sm:$0xff] }
  0x27   : > { %879 = vmatpush3.bf16.msra.mxu0 %v936_v10  ;;  %400 = vperm.xlu0 %933, %v362_v14   ;;  %v693_v27 = vld [vmem:[%s1181_s5] sm:$0xff]  ;;  %v694_v28 = vld [vmem:[%s1181_s5 + $0x8] sm:$0xff]  ;;  %v695_v30 = vld [vmem:[%s1181_s5 + $0x10] sm:$0xff] }
  0x28   : > { %880 = vmatprep.subr.bf16.mxu0 %v937_v12  ;;  %390 = vperm.xlu1 %934, %v360_v15   ;;  %v543_v29 = vld [vmem:[%s1180_s4 + $0x20] sm:$0xff]  ;;  %v544_v31 = vld [vmem:[%s1180_s4 + $0x28] sm:$0xff]  ;;  %v696_v32 = vld [vmem:[%s1181_s5 + $0x18] sm:$0xff] }
  0x29   : > { %v545_v33 = vld [vmem:[%s1180_s4 + $0x30] sm:$0xff]  ;;  %v697_v34 = vld [vmem:[%s1181_s5 + $0x20] sm:$0xff]  ;;  %v546_v35 = vld [vmem:[%s1180_s4 + $0x38] sm:$0xff] }
  0x2a   : > { %v698_v36 = vld [vmem:[%s1181_s5 + $0x28] sm:$0xff]  ;;  %v699_v37 = vld [vmem:[%s1181_s5 + $0x30] sm:$0xff]  ;;  %v700_v38 = vld [vmem:[%s1181_s5 + $0x38] sm:$0xff] }
  0x2b   : > { %881 = vmatpush3.bf16.msra.mxu0 %v937_v12  ;;  %375 = vperm.xlu0 %933, %v357_v16   ;;  %v762_v39 = vld [vmem:[#allocation2] sm:$0x1]  ;;  %v943_v13 = vld [vmem:[%s1179_s3 + $0x8] sm:$0xff]   ;;  %v944_v14 = vld [vmem:[%s1179_s3 + $0x10] sm:$0xff]  }
  0x2c   : > { %380 = vperm.xlu1 %934, %v358_v18   ;;  %v942_v40 = vld [vmem:[%s1179_s3] sm:$0xff]   ;;  %v945_v15 = vld [vmem:[%s1179_s3 + $0x18] sm:$0xff]  }
  0x2d   : > { %898 = vmatprep.mubr.msk.bf16.mxu1 %vm607_vm1, %v942_v40 }
  0x2e   : > { %883 = vmatmul.mubr.msk.bf16.vlgmr.msra.gmra.mxu0 %vm441_vm0, %v939_v17 }
  0x2f   : > { %886 = vmatprep.mubr.msk.bf16.mxu0 %vm441_vm0, %v940_v19  ;;  %365 = vperm.xlu0 %933, %v355_v20  }
  0x30   : > { %370 = vperm.xlu1 %934, %v356_v21  }
  0x33   : > { %549 = vperm.xlu0 %933, %v539_v22  }
  0x34   : > { %554 = vperm.xlu1 %934, %v540_v24  }
  0x36   : > { %887 = vmatmul.mubr.msk.bf16.gmra.mxu0 %vm441_vm0, %v941_v23 }
  0x37   : > { %559 = vperm.xlu0 %933, %v541_v25  }
  0x38   : > { %564 = vperm.xlu1 %934, %v542_v26  }
  0x3b   : > { %703 = vperm.xlu0 %933, %v693_v27  }
  0x3c   : > { %708 = vperm.xlu1 %934, %v694_v28  }
  0x3f   : > { %569 = vperm.xlu0 %933, %v543_v29  }
  0x40   : > { %713 = vperm.xlu1 %934, %v695_v30  }
  0x43   : > { %574 = vperm.xlu0 %933, %v544_v31  }
  0x44   : > { %718 = vperm.xlu1 %934, %v696_v32  }
  0x47   : > { %579 = vperm.xlu0 %933, %v545_v33  }
  0x48   : > { %723 = vperm.xlu1 %934, %v697_v34  }
  0x4b   : > { %584 = vperm.xlu0 %933, %v546_v35  }
  0x4c   : > { %728 = vperm.xlu1 %934, %v698_v36  }
  0x4f   : > { %733 = vperm.xlu0 %933, %v699_v37  }
  0x50   : > { %738 = vperm.xlu1 %934, %v700_v38  }
  0x53   : > { %765 = vperm.xlu0 %933, %v762_v39  }
  0x9e   : > { %v396_v43 = vpop.permute.xlu0 %395 }
  0x9f   : > { %v386_v41 = vpop.permute.xlu1 %385 }
  0xa2   : > { %v401_v48 = vpop.permute.xlu0 %400 }
  0xa3   : > { %v391_v46 = vpop.permute.xlu1 %390 }
  0xa6   : > { %v376_v56 = vpop.permute.xlu0 %375 }
  0xa7   : > { %v381_v52 = vpop.permute.xlu1 %380 }
  0xaa   : > { %v366_v6 = vpop.permute.xlu0 %365 }
  0xab   : > { %v371_v2 = vpop.permute.xlu1 %370 }
  0xae   : > { %v550_v16 = vpop.permute.xlu0 %549 }
  0xaf   : > { %v555_v17 = vpop.permute.xlu1 %554 }
  0xb2   : > { %v560_v18 = vpop.permute.xlu0 %559 }
  0xb3   : > { %v565_v19 = vpop.permute.xlu1 %564 }
  0xb6   : > { %v704_v20 = vpop.permute.xlu0 %703 }
  0xb7   : > { %v709_v21 = vpop.permute.xlu1 %708 }
  0xba   : > { %v570_v22 = vpop.permute.xlu0 %569 }
  0xbb   : > { %v714_v23 = vpop.permute.xlu1 %713 }
  0xbe   : > { %v575_v25 = vpop.permute.xlu0 %574 }
  0xbf   : > { %v719_v28 = vpop.permute.xlu1 %718 }
  0xc2   : > { %v580_v35 = vpop.permute.xlu0 %579 }
  0xc3   : > { %v724_v39 = vpop.permute.xlu1 %723 }
  0xee   : > { %v884_v42 = vpop.f32.mrf.mxu0 }
  0xef   : > { %v497_v62 = vadd.f32 %v884_v42, %v376_v56  ;;  %v729_v56 = vpop.permute.xlu1 %728 }
  0xf0   : > { %v488_v44 = vpop.f32.mrf.mxu0 }
  0xf1   : > { %v521_v7 = vmax.f32 %v497_v62, 0.0  ;;  %v489_v8 = vadd.f32 %v488_v44, %v366_v6  ;;  %v768_v6 = vlaneseq }
  0xf2   : > { %v885_v45 = vpop.f32.mrf.mxu0 }
  0xf3   : > { %v500_v58 = vadd.f32 %v885_v45, %v381_v52  ;;  %v519_v11 = vmax.f32 %v489_v8, 0.0 }
  0xf4   : > { %v491_v47 = vpop.f32.mrf.mxu0 }
  0xf5   : > { %v522_v3 = vmax.f32 %v500_v58, 0.0  ;;  %v492_v4 = vadd.f32 %v491_v47, %v371_v2 }
  0xf6   : > { %v888_v49 = vpop.f32.mrf.mxu0 }
  0xf7   : > { %v513_v51 = vadd.f32 %v888_v49, %v396_v43  ;;  %v536_v9 = vpack.c.bf16 %v522_v3, %v521_v7  ;;  %v520_v10 = vmax.f32 %v492_v4, 0.0  ;;  %v739_v3 = vpop.permute.xlu1 %738 }
  0xf8   : > { %v504_v50 = vpop.f32.mrf.mxu0 }
  0xf9   : > { %v505_v54 = vadd.f32 %v504_v50, %v386_v41  ;;  %v525_v59 = vmax.f32 %v513_v51, 0.0  ;;  %v535_v12 = vpack.c.bf16 %v520_v10, %v519_v11  ;;  %v585_v50 = vpop.permute.xlu0 %584 }
  0xfa   : > { %v889_v53 = vpop.f32.mrf.mxu0 }
  0xfb   : > { %v516_v55 = vadd.f32 %v889_v53, %v401_v48  ;;  %v523_v63 = vmax.f32 %v505_v54, 0.0 }
  0xfc   : > { %v507_v57 = vpop.f32.mrf.mxu0 }
  0xfd   : > { %v526_v60 = vmax.f32 %v516_v55, 0.0  ;;  %v508_v61 = vadd.f32 %v507_v57, %v391_v46 }
  0xff   : > { %v524_v0 = vmax.f32 %v508_v61, 0.0  ;;  %v538_v1 = vpack.c.bf16 %v526_v60, %v525_v59 }
 0x101   : > { %v537_v5 = vpack.c.bf16 %v524_v0, %v523_v63  ;;  %890 = vmatprep.subr.bf16.mxu1 %v538_v1  ;;  %v734_v0 = vpop.permute.xlu0 %733 }
 0x102   : > { %891 = vmatpush3.bf16.msra.mxu1 %v538_v1 }
 0x103   : > { %892 = vmatprep.subr.bf16.mxu1 %v537_v5 }
 0x106   : > { %893 = vmatpush3.bf16.msra.mxu1 %v537_v5 }
 0x107   : > { %894 = vmatprep.subr.bf16.mxu1 %v536_v9 }
 0x10a   : > { %895 = vmatpush3.bf16.msra.mxu1 %v536_v9  ;;  %v769_v9 = vshrl.u32 %v768_v6, 7 }
 0x10b   : > { %896 = vmatprep.subr.bf16.mxu1 %v535_v12 }
 0x10e   : > { %897 = vmatpush3.bf16.msra.mxu1 %v535_v12  ;;  %v770_v12 = vsub.s32 0, %v769_v9 }
 0x111   : > { %899 = vmatmul.mubr.msk.bf16.vlgmr.msra.gmra.mxu1 %vm607_vm1, %v943_v13 }
 0x112   : > { %902 = vmatprep.mubr.msk.bf16.mxu1 %vm607_vm1, %v944_v14  ;;  %v766_v14 = vpop.permute.xlu0 %765 }
 0x119   : > { %903 = vmatmul.mubr.msk.bf16.gmra.mxu1 %vm607_vm1, %v945_v15 }
 0x1d1   : > { %v900_v24 = vpop.f32.mrf.mxu1 }
 0x1d2   : > { %v663_v30 = vadd.f32 %v900_v24, %v560_v18 }
 0x1d3   : > { %v654_v26 = vpop.f32.mrf.mxu1 }
 0x1d4   : > { %v655_v27 = vadd.f32 %v654_v26, %v550_v16  ;;  %v687_v37 = vmax.f32 %v663_v30, 0.0  ;;  %v771_v16 = vrot.slane %v766_v14, %v770_v12 }
 0x1d5   : > { %v901_v29 = vpop.f32.mrf.mxu1 }
 0x1d6   : > { %v685_v32 = vmax.f32 %v655_v27, 0.0  ;;  %v666_v33 = vadd.f32 %v901_v29, %v565_v19  ;;  %v743_v46 = vmul.f32 %v714_v23, %v687_v37 }
 0x1d7   : > { %v657_v31 = vpop.f32.mrf.mxu1 }
 0x1d8   : > { %v658_v34 = vadd.f32 %v657_v31, %v555_v17  ;;  %v741_v41 = vmul.f32 %v704_v20, %v685_v32  ;;  %v688_v42 = vmax.f32 %v666_v33, 0.0 }
 0x1d9   : > { %v904_v36 = vpop.f32.mrf.mxu1 }
 0x1da   : > { %v686_v38 = vmax.f32 %v658_v34, 0.0  ;;  %v679_v48 = vadd.f32 %v904_v36, %v580_v35  ;;  %v744_v52 = vmul.f32 %v719_v28, %v688_v42 }
 0x1db   : > { %v670_v40 = vpop.f32.mrf.mxu1 }
 0x1dc   : > { %v742_v43 = vmul.f32 %v709_v21, %v686_v38  ;;  %v671_v44 = vadd.f32 %v670_v40, %v570_v22  ;;  %v691_v57 = vmax.f32 %v679_v48, 0.0 }
 0x1dd   : > { %v905_v45 = vpop.f32.mrf.mxu1 }
 0x1de   : > { %v749_v47 = vadd.f32 %v742_v43, %v741_v41  ;;  %v689_v49 = vmax.f32 %v671_v44, 0.0  ;;  %v682_v54 = vadd.f32 %v905_v45, %v585_v50  ;;  %v747_v1 = vmul.f32 %v734_v0, %v691_v57 }
 0x1df   : > { %v673_v51 = vpop.f32.mrf.mxu1 }
 0x1e0   : > { %v750_v53 = vadd.f32 %v749_v47, %v743_v46  ;;  %v674_v55 = vadd.f32 %v673_v51, %v575_v25  ;;  %v745_v58 = vmul.f32 %v724_v39, %v689_v49  ;;  %v692_v62 = vmax.f32 %v682_v54, 0.0 }
 0x1e2   : > { %v751_v59 = vadd.f32 %v750_v53, %v744_v52  ;;  %v690_v60 = vmax.f32 %v674_v55, 0.0  ;;  %v748_v4 = vmul.f32 %v739_v3, %v692_v62 }
 0x1e4   : > { %v752_v61 = vadd.f32 %v751_v59, %v745_v58  ;;  %v746_v63 = vmul.f32 %v729_v56, %v690_v60 }
 0x1e6   : > { %v753_v2 = vadd.f32 %v752_v61, %v746_v63 }
 0x1e8   : > { %v754_v5 = vadd.f32 %v753_v2, %v747_v1 }
 0x1ea   : > { %v755_v7 = vadd.f32 %v754_v5, %v748_v4 }
 0x1ec   : > { %v756_v8 = vrot.slane %v755_v7, 4 }
 0x1ee   : > { %v757_v10 = vadd.f32 %v756_v8, %v755_v7 }
 0x1f0   : > { %v758_v11 = vrot.slane %v757_v10, 2 }
 0x1f2   : > { %v759_v13 = vadd.f32 %v758_v11, %v757_v10 }
 0x1f4   : > { %v760_v15 = vrot.slane %v759_v13, 1 }
 0x1f6   : > { %v761_v17 = vadd.f32 %v760_v15, %v759_v13 }
 0x1f8   : > { %v772_v18 = vadd.f32 %v771_v16, %v761_v17 }
 0x1fa   : > { %v858_v19 = vmul.f32 -1.442695, %v772_v18 }
 0x1fc   : > { %946 = vpow2.f32 %v858_v19 }
 0x209   : > { %v947_v20 = vpop.eup %946 }
 0x20a   : > { %v776_v21 = vadd.f32 1.0, %v947_v20 }
 0x20c   : > { %948 = vrcp.f32 %v776_v21 }
 0x219   : > { %v949_v22 = vpop.eup %948 }
 0x21a   : > { %779 = vst [vmem:[%s339_s10] sm:$0x1] %v949_v22 }
 0x21b PF: > { %p16_p9 = scmp.ge.s32.totalorder %s1035_s29, 5   ;;  %s1184_s26 = smov %s968_s27 }
 0x21c   : > { %s1185_s27 = smov %s1044_s9  ;;  %s1186_s28 = smov %s1035_s29 }
 0x21d   :  { %18 = sbr.rel (!%p16_p9) target bundleno = 5 (0x5), region = 124 }

</bundles_post_ra>
